<compile_context>
chip_gen: v7x
topology: tpu7x:2x2x1
jax: 0.10.0
libtpu: 0.0.40
codegen_flags: <defaults>
</compile_context>

<pallas_src>
import functools

import jax
import jax.numpy as jnp
from jax.experimental import pallas as pl
from jax.experimental.pallas import tpu as pltpu


def _ese_kernel(x_ref, wt_ref, b_ref, o_ref, *, channels_last):
    # x_ref : (Bt, HW, C) if channels_last else (Bt, C, HW)
    # wt_ref: (C, C)   transposed 1x1-conv weight, [c_in, c_out], native dtype
    # b_ref : (1, C)   conv bias
    spatial_axis = -2 if channels_last else -1

    # Global average pool with widening f32 accumulation, read straight from
    # the pipeline buffer (do not bind + upcast the whole tile).
    y = jnp.mean(x_ref[...], axis=spatial_axis, dtype=jnp.float32)   # (Bt, C)

    # 1x1 conv == channel-mixing matmul + bias. Weight stays in its native
    # dtype (resident block); y is cast to it, MXU accumulates in f32.
    wt = wt_ref[...]
    z = jnp.dot(y.astype(wt.dtype), wt, preferred_element_type=jnp.float32)
    z = z + b_ref[...].astype(jnp.float32)

    # ReLU then Sigmoid (exact module order).
    z = jax.nn.sigmoid(jnp.maximum(z, 0.0))                          # (Bt, C)

    # Scale every spatial position; multiply in the input dtype (for bf16 x
    # this is a deliberate precision tradeoff: z is downcast before the mul).
    z = z.astype(o_ref.dtype)
    if channels_last:
        o_ref[...] = x_ref[...] * z[:, None, :]   # lane-aligned broadcast over HW
    else:
        o_ref[...] = x_ref[...] * z[:, :, None]


def _tpu_params():
    """(target_block_bytes, vmem_capacity_bytes), generation-aware with safe fallbacks."""
    kind = ""
    try:
        kind = jax.devices()[0].device_kind.lower()
    except Exception:
        pass
    vmem_cap = None
    try:
        vmem_cap = int(pltpu.get_tpu_info().vmem_capacity_bytes)
    except Exception:
        pass
    if "v7" in kind:
        target, default_cap = 6 << 20, 64 << 20     # 3.2 TB/s HBM, 64 MiB VMEM
    elif "v6" in kind:
        target, default_cap = 4 << 20, 128 << 20    # ~1.4 TB/s HBM
    else:
        target, default_cap = 2 << 20, 128 << 20    # v5e ~0.8 TB/s: 2 MiB is plenty
    if vmem_cap is None:
        vmem_cap = default_cap
    return target, vmem_cap


def ese_module_forward(x, w, b, *, channels_last=False, target_block_bytes=None,
                       alias_input=False):
    """eSE forward.

    x: (B, C, H, W) if channels_last=False (PyTorch layout), else (B, H, W, C).
    w: (C, C) or (C, C, 1, 1) Conv2d(C, C, 1) weight.  b: (C,).
    Returns an array of the same shape/dtype as x.
    """
    if channels_last:
        B, H, W, C = x.shape
    else:
        B, C, H, W = x.shape
    HW = H * W
    itemsize = jnp.dtype(x.dtype).itemsize

    w = jnp.asarray(w)
    if w.ndim == 4:                       # Conv2d weight (C_out, C_in, 1, 1)
        w = w.reshape(w.shape[0], w.shape[1])
    wt = w.T                              # (c_in, c_out): z = y @ wt
    b2 = jnp.asarray(b).reshape(1, C)
    w_bytes = wt.size * jnp.dtype(wt.dtype).itemsize
    b_bytes = b2.size * jnp.dtype(b2.dtype).itemsize

    auto_target, vmem_cap = _tpu_params()
    if target_block_bytes is None:
        target_block_bytes = auto_target

    # --- batch-tile sizing ----------------------------------------------------
    per_batch_bytes = max(1, C * HW * itemsize)
    # 2 (double buffer) x 2 (in + out) streamed blocks plus 2x resident
    # weight/bias must fit comfortably inside VMEM.
    max_block_bytes = max(per_batch_bytes,
                          (int(0.75 * vmem_cap) - 2 * (w_bytes + b_bytes)) // 4)
    bt = max(1, min(B,
                    target_block_bytes // per_batch_bytes,
                    max_block_bytes // per_batch_bytes))
    # Guarantee >= 2 grid blocks whenever B >= 2 so both v7x TensorCores work.
    if B >= 2:
        bt = min(bt, pl.cdiv(B, 2))
    nblocks = pl.cdiv(B, bt)              # partial last block is masked; no Bt | B needed

    block_bytes = bt * per_batch_bytes
    need = 4 * block_bytes + 2 * (w_bytes + b_bytes) + (2 << 20)
    vmem_limit = int(min(max(need, 16 << 20), int(0.9 * vmem_cap)))

    x_block = (bt, HW, C) if channels_last else (bt, C, HW)
    x2 = x.reshape(B, *x_block[1:])

    cost = pl.CostEstimate(
        flops=B * (2 * C * C + 3 * C * HW),
        transcendentals=B * C,
        bytes_accessed=2 * B * C * HW * itemsize + w_bytes + b_bytes,
    )

    kernel = functools.partial(_ese_kernel, channels_last=channels_last)

    out = pl.pallas_call(
        kernel,
        out_shape=jax.ShapeDtypeStruct((B,) + x_block[1:], x.dtype),
        grid_spec=pltpu.PrefetchScalarGridSpec(
            num_scalar_prefetch=0,
            grid=(nblocks,),
            in_specs=[
                pl.BlockSpec(x_block, lambda i: (i, 0, 0)),   # streamed x batch-tile
                pl.BlockSpec((C, C), lambda i: (0, 0)),       # resident weight
                pl.BlockSpec((1, C), lambda i: (0, 0)),       # resident bias
            ],
            out_specs=pl.BlockSpec(x_block, lambda i: (i, 0, 0)),
        ),
        compiler_params=pltpu.CompilerParams(
            dimension_semantics=("parallel",),
            vmem_limit_bytes=vmem_limit,
        ),
        cost_estimate=cost,
        input_output_aliases=({0: 0} if alias_input else {}),
    )(x2, wt, b2)
    # TODO(synk): for B == 1, a second grid axis over HW (two-pass
    # reduce-then-scale) would be needed to occupy both v7x TensorCores.
    return out.reshape(x.shape)


def _reference(x, w, b, channels_last=False):
    # Pure-JAX reference matching the PyTorch module.
    axes = (1, 2) if channels_last else (2, 3)
    y = jnp.mean(x, axis=axes)                          # (B, C)
    z = y @ w.T + b                                     # 1x1 conv + bias
    z = jax.nn.sigmoid(jnp.maximum(z, 0.0))
    if channels_last:
        return x * z[:, None, None, :]
    return x * z[:, :, None, None]


if __name__ == "__main__":
    # 1) Primary NCHW test (matches the PyTorch module layout).
    B, C, H, W = 2, 4, 16, 16
    kx, kw, kb = jax.random.split(jax.random.PRNGKey(0), 3)
    x = jax.random.normal(kx, (B, C, H, W), dtype=jnp.float32)
    w = jax.random.normal(kw, (C, C), dtype=jnp.float32) * 0.1
    b = jax.random.normal(kb, (C,), dtype=jnp.float32) * 0.1
    out = jax.block_until_ready(ese_module_forward(x, w, b))
    assert out.shape == (B, C, H, W)
    assert jnp.allclose(out, _reference(x, w, b), atol=1e-5, rtol=1e-5), \
        "mismatch vs reference (NCHW)"

    # 2) NCHW with HW = 7*7 = 49 (masked-lane mean) and non-divisible batch
    #    (B=3 -> Bt=2 -> masked partial last block).
    B2, C2, H2, W2 = 3, 8, 7, 7
    kx2, kw2, kb2 = jax.random.split(jax.random.PRNGKey(1), 3)
    x2 = jax.random.normal(kx2, (B2, C2, H2, W2), dtype=jnp.float32)
    w2 = jax.random.normal(kw2, (C2, C2), dtype=jnp.float32) * 0.1
    b2 = jax.random.normal(kb2, (C2,), dtype=jnp.float32) * 0.1
    out2 = jax.block_until_ready(ese_module_forward(x2, w2, b2))
    assert jnp.allclose(out2, _reference(x2, w2, b2), atol=1e-5, rtol=1e-5), \
        "mismatch vs reference (NCHW, HW=49, ragged batch)"

    # 3) Channels-last path: C on the lane axis (preferred TPU layout).
    B3, H3, W3, C3 = 2, 7, 7, 8
    kx3, kw3, kb3 = jax.random.split(jax.random.PRNGKey(2), 3)
    x3 = jax.random.normal(kx3, (B3, H3, W3, C3), dtype=jnp.float32)
    w3 = jax.random.normal(kw3, (C3, C3), dtype=jnp.float32) * 0.1
    b3 = jax.random.normal(kb3, (C3,), dtype=jnp.float32) * 0.1
    out3 = jax.block_until_ready(
        ese_module_forward(x3, w3, b3, channels_last=True))
    assert jnp.allclose(out3, _reference(x3, w3, b3, channels_last=True),
                        atol=1e-5, rtol=1e-5), "mismatch vs reference (NHWC)"

    print("KERNEL_OK")
</pallas_src>

<mosaic_0001>
module attributes {stable_mosaic.version = 11 : i64} {
  func.func @_ese_kernel(%arg0: i32, %arg1: memref<1x4x256xf32, #tpu.memory_space<vmem>>, %arg2: memref<4x4xf32, #tpu.memory_space<vmem>>, %arg3: memref<1x4xf32, #tpu.memory_space<vmem>>, %arg4: memref<1x4x256xf32, #tpu.memory_space<vmem>>) attributes {dimension_semantics = [#tpu.dimension_semantics<parallel>], iteration_bounds = array<i64: 2>, scalar_prefetch = 0 : i64, scratch_operands = 0 : i64, tpu.core_type = #tpu.core_type<tc>, window_params = [{transform_indices = @transform_0, window_bounds = array<i64: 1, 4, 256>}, {pipeline_mode = #tpu.pipeline_mode<synchronous>, transform_indices = @transform_1, window_bounds = array<i64: 4, 4>}, {pipeline_mode = #tpu.pipeline_mode<synchronous>, transform_indices = @transform_2, window_bounds = array<i64: 1, 4>}, {transform_indices = @transform_3, window_bounds = array<i64: 1, 4, 256>}]} {
    %c0 = arith.constant 0 : index
    %c0_0 = arith.constant 0 : index
    %c0_1 = arith.constant 0 : index
    %0 = vector.load %arg1[%c0, %c0_0, %c0_1] : memref<1x4x256xf32, #tpu.memory_space<vmem>>, vector<1x4x256xf32>
    %cst = arith.constant dense<0.000000e+00> : vector<1x4xf32>
    %1 = vector.multi_reduction <add>, %0, %cst [2] : vector<1x4x256xf32> to vector<1x4xf32>
    %cst_2 = arith.constant 2.560000e+02 : f32
    %2 = vector.broadcast %cst_2 : f32 to vector<1x4xf32>
    %3 = arith.divf %1, %2 : vector<1x4xf32>
    %c0_3 = arith.constant 0 : index
    %c0_4 = arith.constant 0 : index
    %4 = vector.load %arg2[%c0_3, %c0_4] : memref<4x4xf32, #tpu.memory_space<vmem>>, vector<4x4xf32>
    %cst_5 = arith.constant dense<0.000000e+00> : vector<1x4xf32>
    %5 = tpu.matmul %3, %4, %cst_5 {dimension_numbers = #tpu.dot_dimension_numbers<[1], [0], [0], [1], [0, 0, 1, 1], [], []>} : vector<1x4xf32>, vector<4x4xf32>, vector<1x4xf32> -> vector<1x4xf32>
    %c0_6 = arith.constant 0 : index
    %c0_7 = arith.constant 0 : index
    %6 = vector.load %arg3[%c0_6, %c0_7] : memref<1x4xf32, #tpu.memory_space<vmem>>, vector<1x4xf32>
    %7 = arith.addf %5, %6 : vector<1x4xf32>
    %cst_8 = arith.constant 0.000000e+00 : f32
    %8 = vector.broadcast %cst_8 : f32 to vector<1x4xf32>
    %9 = arith.maximumf %7, %8 : vector<1x4xf32>
    %10 = arith.negf %9 : vector<1x4xf32>
    %11 = math.exp %10 : vector<1x4xf32>
    %cst_9 = arith.constant 1.000000e+00 : f32
    %12 = vector.broadcast %cst_9 : f32 to vector<1x4xf32>
    %13 = arith.addf %12, %11 : vector<1x4xf32>
    %14 = arith.divf %12, %13 : vector<1x4xf32>
    %c0_10 = arith.constant 0 : index
    %c0_11 = arith.constant 0 : index
    %c0_12 = arith.constant 0 : index
    %15 = vector.load %arg1[%c0_10, %c0_11, %c0_12] : memref<1x4x256xf32, #tpu.memory_space<vmem>>, vector<1x4x256xf32>
    %16 = vector.shape_cast %14 : vector<1x4xf32> to vector<1x4x1xf32>
    %17 = vector.broadcast %16 : vector<1x4x1xf32> to vector<1x4x256xf32>
    %18 = arith.mulf %15, %17 : vector<1x4x256xf32>
    %c0_13 = arith.constant 0 : index
    %c0_14 = arith.constant 0 : index
    %c0_15 = arith.constant 0 : index
    %19 = vector.load %arg4[%c0_13, %c0_14, %c0_15] : memref<1x4x256xf32, #tpu.memory_space<vmem>>, vector<1x4x256xf32>
    tpu.vector_store %arg4[%c0_13, %c0_14, %c0_15], %18 {strides = array<i32>} : memref<1x4x256xf32, #tpu.memory_space<vmem>>, vector<1x4x256xf32>,
    return
  }
  func.func @transform_0(%arg0: i32) -> (i32, i32, i32) {
    %c0_i32 = arith.constant 0 : i32
    %c0_i32_0 = arith.constant 0 : i32
    %c0_i32_1 = arith.constant 0 : i32
    return %arg0, %c0_i32, %c0_i32_0 : i32, i32, i32
  }
  func.func @transform_1(%arg0: i32) -> (i32, i32) {
    %c0_i32 = arith.constant 0 : i32
    %c0_i32_0 = arith.constant 0 : i32
    %c0_i32_1 = arith.constant 0 : i32
    return %c0_i32, %c0_i32_0 : i32, i32
  }
  func.func @transform_2(%arg0: i32) -> (i32, i32) {
    %c0_i32 = arith.constant 0 : i32
    %c0_i32_0 = arith.constant 0 : i32
    %c0_i32_1 = arith.constant 0 : i32
    return %c0_i32, %c0_i32_0 : i32, i32
  }
  func.func @transform_3(%arg0: i32) -> (i32, i32, i32) {
    %c0_i32 = arith.constant 0 : i32
    %c0_i32_0 = arith.constant 0 : i32
    %c0_i32_1 = arith.constant 0 : i32
    return %arg0, %c0_i32, %c0_i32_0 : i32, i32, i32
  }
}

</mosaic_0001>

<bundles_post_ra>
// kernel: tpu_custom_call.1
= control target key start
LH: loop header
LB: loop body
LE: loop exit
PB: predicated region body
PF: predicated region fallthrough
CT: control target
= control target key end

     0   :  { %8 = vsyncpa [#allocation3], 0  ;;  %s874_s0 = inlined_call_operand.hbm [shape: f32[2,4,256], index: 0, kind: input, shape index: {}]   ;;  %s875_s1 = inlined_call_operand.hbm [shape: f32[4,4], index: 1, kind: input, shape index: {}]   ;;  %s876_s2 = inlined_call_operand.vmem [shape: f32[1,4], index: 2, kind: input, shape index: {}]   ;;  %s877_s3 = inlined_call_operand.hbm [shape: f32[2,4,256], index: 3, kind: output, shape index: {}]  }
   0x1   :  { %10 = vsyncpa [#allocation3 + $0x1], 0 }
   0x2   :  { %11 = vsyncpa [#allocation6], 0 }
   0x3   :  { %12 = vsyncpa [#allocation4], 0 }
   0x4   :  { %14 = vsyncpa [#allocation4 + $0x1], 0  ;;  %s666_s12 = smov 0   ;;  %s668_s13 = smov 0  }
   0x5   :  { %s670_s14 = smov 0   ;;  %s672_s15 = smov 0  }
   0x6 LB: > { %s687_s16 = sadd.s32 4294967295, %s638_s15   ;;  %s417_s17 = sadd.s32 4294967294, %s638_s15   ;;  %s638_s15 = sphi %s672_s15, %s901_s15   ;;  %s634_s14 = sphi %s670_s14, %s900_s14   ;;  %s630_s13 = sphi %s668_s13, %s899_s13   ;;  %s626_s12 = sphi %s666_s12, %s898_s12  }
   0x7   : > { %p40_p0 = scmp.ne.s32.totalorder %s630_s13, %s626_s12  ;;  %p878_p1 = scmp.eq.s32.totalorder %s687_s16, 0 }
   0x8   : > { %p112_p3 = scmp.eq.s32.totalorder %s417_s17, 1  ;;  %p418_p5 = scmp.ge.s32.totalorder %s638_s15, 1 }
   0x9   : > { %p696_p4 = por %p878_p1, %p40_p0  ;;  %p119_p7 = scmp.lt.s32.totalorder %s638_s15, 3 }
   0xa   : > { %p701_p6 = por %p112_p3, %p40_p0  ;;  %s640_s21 = smov [#allocation5]  }
   0xb   : > { %s881_s18 = scalar_select %p696_p4, 1, 0 }
   0xc   : > { %s882_s19 = scalar_select %p701_p6, 1, 0 }
   0xd   : > { %p706_p8 = pnand %p418_p5, %p119_p7  ;;  %s132_s22 = sshll.u32 %s640_s21, 4  ;;  %s133_s22 = int_to_ptr.vmem [resolvable:$true] %s132_s22 }
   0xe   : > { %s714_s23 = sadd.s32 1, %s638_s15   ;;  %s27_s27 = sadd.s32 1, %s634_s14 }
   0xf   : > { %s883_s20 = scalar_select %p706_p8, 1, 0 }
  0x10   : > { %p453_p10 = pneg %p706_p8  ;;  %s24_s25 = ssub.s32 %s638_s15, %s714_s23 }
  0x11   : > { %p724_p12 = scmp.eq.s32.totalorder %s24_s25, 0  ;;  %s510_s30 = scalar_lea.hbm %s875_s1, 64 }
  0x12   : > { %p718_p11 = pnand %p453_p10, %p878_p1  ;;  %p511_p0 = scmp.ne.s32.totalorder %s875_s1, %s510_s30 }
  0x13   : > { %s885_s26 = scalar_select %p724_p12, 1, 0 }
  0x14   : > { %p512_p3 = pneg %p718_p11  ;;  %p517_p10 = scmp.lt.u32.totalorder %s510_s30, %s875_s1 }
  0x16   : > { %p513_p5 = pnand %p512_p3, %p511_p0 }
  0x18   : > { %p514_p7 = pneg %p513_p5 }
  0x1a   : > { %p519_p9 = pnand %p517_p10, %p514_p7 }
  0x1c   : > { %522 = shalt.err (!%p519_p9)
}
  0x1d   : > { %s523_s8 = scalar_lea.vmem %s133_s22, 64  ;;  %p531_p6 = scmp.lt.s32.totalorder %s133_s22, %s133_s22 }
  0x1e   : > { %p524_p1 = scmp.ne.s32.totalorder %s133_s22, %s523_s8  ;;  %p532_p4 = scmp.lt.s32.totalorder %s523_s8, %s523_s8 }
  0x20   : > { %p526_p2 = pnand %p524_p1, %p512_p3  ;;  %p533_p8 = por %p532_p4, %p531_p6 }
  0x22   : > { %p527_p13 = pneg %p526_p2 }
  0x24   : > { %p534_p12 = pnand %p533_p8, %p527_p13 }
  0x26   : > { %537 = shalt.err (!%p534_p12)
}
  0x27   : > { %456 = dma.hbm_to_vmem [thread:$0]  (!%p718_p11), %s875_s1, 64, %s133_s22, [#allocation6]  }
  0x28   : > { %p886_p1 = scmp.ne.s32.totalorder %s885_s26, 0  ;;  %p35_p2 = scmp.eq.s32.totalorder %s638_s15, 0 }
  0x29   : > { %p887_p4 = scmp.ne.s32.totalorder %s634_s14, %s630_s13  ;;  %p888_p6 = scmp.eq.s32.totalorder %s687_s16, 1 }
  0x2a   : > { %s750_s11 = scalar_select %p886_p1, %s634_s14, %s27_s27  }
  0x2b   : > { %p758_p8 = por %p888_p6, %p887_p4  ;;  %p466_p9 = scmp.lt.s32.totalorder %s638_s15, 2 }
  0x2c   : > { %s146_s21 = sand.u32 1, %s634_s14   ;;  %p890_p12 = pmov %p887_p4 }
  0x2d   : > { %s421_s24 = sshll.u32 %s146_s21, 3  ;;  %s436_s25 = sshll.u32 %s638_s15, 7 }
  0x2e   : > { %p36_p13 = por %p35_p2, %p890_p12  ;;  %s771_s22 = scalar_lea.hbm %s874_s0, %s436_s25 }
  0x2f   : > { %s150_s26 = scalar_lea.vmem [#allocation2], %s421_s24  ;;  %s147_s4 = scalar_lea.sflag [#allocation3], %s146_s21 }
  0x30   : > { %s158_s27 = sshll.u32 %s150_s26, 4  ;;  %p773_p11 = pnand %p466_p9, %p36_p13  ;;  %s777_s27 = int_to_ptr.vmem [resolvable:$true] %s158_s27 }
  0x31   : > { %s538_s5 = scalar_lea.hbm %s771_s22, 128  ;;  %s543_s8 = scalar_lea.hbm %s874_s0, 256 }
  0x32   : > { %p539_p0 = scmp.ne.s32.totalorder %s771_s22, %s538_s5  ;;  %p540_p3 = pneg %p773_p11 }
  0x33   : > { %p544_p10 = scmp.lt.u32.totalorder %s771_s22, %s874_s0  ;;  %p545_p1 = scmp.lt.u32.totalorder %s543_s8, %s538_s5 }
  0x34   : > { %p541_p5 = pnand %p540_p3, %p539_p0  ;;  %p547_p4 = scmp.lt.u32.totalorder %s538_s5, %s771_s22 }
  0x35   : > { %p546_p2 = por %p545_p1, %p544_p10 }
  0x36   : > { %p542_p7 = pneg %p541_p5 }
  0x37   : > { %p548_p6 = por %p547_p4, %p546_p2 }
  0x39   : > { %p549_p9 = pnand %p548_p6, %p542_p7 }
  0x3b   : > { %552 = shalt.err (!%p549_p9)
}
  0x3c   : > { %s553_s21 = scalar_lea.vmem %s777_s27, 128  ;;  %s641_s24 = smov [#allocation2]  }
  0x3d   : > { %p554_p12 = scmp.ne.s32.totalorder %s777_s27, %s553_s21  ;;  %s558_s25 = sshll.u32 %s641_s24, 4  ;;  %s559_s25 = int_to_ptr.vmem [resolvable:$false] %s558_s25 }
  0x3e   : > { %s560_s28 = scalar_lea.vmem %s559_s25, 256  ;;  %p561_p5 = scmp.lt.s32.totalorder %s777_s27, %s559_s25 }
  0x3f   : > { %p556_p13 = pnand %p554_p12, %p540_p3  ;;  %p562_p10 = scmp.lt.s32.totalorder %s560_s28, %s553_s21 }
  0x41   : > { %p557_p0 = pneg %p556_p13  ;;  %p563_p1 = por %p562_p10, %p561_p5 }
  0x43   : > { %p564_p2 = pnand %p563_p1, %p557_p0 }
  0x45   : > { %567 = shalt.err (!%p564_p2)
}
  0x46   : > { %460 = dma.hbm_to_vmem [thread:$0]  (!%p773_p11), %s771_s22, 128, %s777_s27, %s147_s4  }
  0x47   : > { %p892_p7 = scmp.ne.s32.totalorder %s883_s20, 0 }
  0x48   : > { %s807_s29 = sand.u32 (!%p892_p7), 1, %s630_s13   ;;  %p893_p3 = scmp.ne.s32.totalorder (!%p892_p7), %s881_s18, 0 }
  0x49   : > { %167 = sbr.rel (%p892_p7) target bundleno = 613 (0x265), region = 32  ;;  %s425_s26 = sshll.u32 (!%p892_p7), %s807_s29, 3 }
  0x4a   : > { %s170_s5 = scalar_lea.sflag (!%p892_p7), [#allocation3], %s807_s29  ;;  %s173_s6 = scalar_lea.vmem (!%p892_p7), [#allocation2], %s425_s26 }
  0x50   : > { %613 = dma.done.wait (%p893_p3), %s170_s5, 128  }
  0x51   : > { %615 = vsyncadd (%p893_p3), %s170_s5, 4294967168  ;;  %p894_p11 = scmp.eq.s32.totalorder %s687_s16, 0 }
  0x53   : > { %617 = dma.done.wait (%p894_p11), [#allocation6], 64   ;;  %p895_p4 = pmov %p894_p11 }
  0x54   : > { %vm204_vm0 = vcmask 1043456   ;;  %v200_v0 = vld [vmem:[%s173_s6] sm:$0xff]  ;;  %v642_v5 = vmov 0.0   ;;  %v212_v6 = vld [vmem:[#allocation5] sm:$0xf]  ;;  %vm643_vm1 = vmmov 0   ;;  %v215_v7 = vlaneseq }
  0x55   : > { %619 = vsyncadd (%p895_p4), [#allocation6], 4294967232  ;;  %v202_v1 = vcombine.high %v200_v0, %v200_v0  ;;  %v205_v2 = vsel %vm204_vm0, %v200_v0, 0.0  ;;  %440 = vmatprep.subr.mxu0 %v642_v5  ;;  %442 = vmatprep.mubr.msk.f32.mxu0 %vm643_vm1, %v642_v5  ;;  %vm221_vm2 = vcmask 31744   ;;  %v213_v14 = vld [vmem:[%s876_s2] sm:$0x1] }
  0x56   : > { %441 = vmatpush3.msk.msra.mxu0 %vm204_vm0, %v212_v6  ;;  %v216_v8 = vand.u32 127, %v215_v7  ;;  %v218_v9 = vshrl.u32 %v215_v7, 7  ;;  %v644_v25 = vmov 839922192   ;;  %s437_s22 = sshll.u32 %s687_s16, 7  ;;  %s199_s27 = scalar_lea.vmem [#allocation7], %s425_s26 }
  0x57   : > { %v206_v3 = vsel %vm204_vm0, %v202_v1, 0.0  ;;  %v313_v26 = vunpack.c.l.s4 %v644_v25  ;;  %s337_s30 = sshll.u32 %s199_s27, 4  ;;  %s830_s8 = scalar_lea.hbm %s877_s3, %s437_s22  ;;  %s832_s30 = int_to_ptr.vmem [resolvable:$true] %s337_s30 }
  0x58   : > { %v207_v4 = vadd.f32 %v206_v3, %v205_v2  ;;  %v219_v10 = vsub.s32 %v216_v8, %v218_v9  ;;  %v306_v22 = vsub.s32 0, %v218_v9  ;;  %s323_s9 = scalar_lea.sflag [#allocation4], %s807_s29  ;;  %s568_s10 = scalar_lea.vmem %s832_s30, 128 }
  0x59   : > { %v314_v27 = vunpack.c.0.s8 %v313_v26  ;;  %p569_p6 = scmp.ne.s32.totalorder %s832_s30, %s568_s10  ;;  %s645_s16 = smov [#allocation7]  }
  0x5a   : > { %208 = vadd.xlane.f32.xlu0 %v207_v4  ;;  %s572_s21 = sshll.u32 %s645_s16, 4  ;;  %s573_s21 = int_to_ptr.vmem [resolvable:$false] %s572_s21 }
  0x5b   : > { %v317_v28 = vsub.s32 %v314_v27, %v218_v9  ;;  %p570_p9 = pnand %p569_p6, %p758_p8  ;;  %s574_s24 = scalar_lea.vmem %s573_s21, 256 }
  0x5c   : > { %p575_p13 = scmp.lt.s32.totalorder %s832_s30, %s573_s21  ;;  %p576_p0 = scmp.lt.s32.totalorder %s574_s24, %s568_s10 }
  0x5d   : > { %p571_p12 = pneg %p570_p9 }
  0x5e   : > { %p577_p5 = por %p576_p0, %p575_p13 }
  0x60   : > { %p578_p10 = pnand %p577_p5, %p571_p12 }
  0xe7   : > { %v209_v11 = vpop.xlane.xlu0 %208 }
  0xe8   : > { %v211_v12 = vmul.f32 0.00390625, %v209_v11 }
  0xea   : > { %v220_v13 = vrot.slane %v211_v12, %v219_v10 }
  0xec   : > { %443 = vmatmul.mubr.msk.f32.vlgmr.msra.gmra.mrb[0].mxu0 %vm221_vm2, %v220_v13 }
 0x1bf   : > { %v293_v15 = vpop.f32.mrb[0].mxu0 }
 0x1c0   : > { %v294_v16 = vadd.f32 %v293_v15, %v213_v14  ;;  %v444_v17 = vpop.f32.mrb[1].mxu0 }
 0x1c2   : > { %v297_v18 = vmax.f32 %v294_v16, 0.0 }
 0x1c4   : > { %v430_v19 = vmul.f32 -1.442695, %v297_v18 }
 0x1c6   : > { %506 = vpow2.f32 %v430_v19 }
 0x1d0   : > { %v507_v20 = vpop.eup %506 }
 0x1d1   : > { %v301_v21 = vadd.f32 1.0, %v507_v20 }
 0x1d3   : > { %508 = vrcp.f32 %v301_v21 }
 0x1dd   : > { %v509_v23 = vpop.eup %508 }
 0x1de   : > { %v307_v24 = vrot.slane %v509_v23, %v306_v22 }
 0x1e0   : > { %309 = vbcast.lane.b32.xlu0 %v307_v24, 256 }
 0x252   : > { %v310_v29 = vpop.permute.xlu0 %309 }
 0x253   : > { %v318_v30 = vrot.slane %v310_v29, %v317_v28 }
 0x255   : > { %v320_v31 = vmul.f32 %v318_v30, %v200_v0 }
 0x257   : > { %321 = vst [vmem:[%s199_s27] sm:$0xff] %v320_v31 }
 0x258   : > { %581 = shalt.err (!%p578_p10)
}
 0x259   : > { %s582_s25 = scalar_lea.hbm %s830_s8, 128  ;;  %s586_s26 = scalar_lea.hbm %s877_s3, 256 }
 0x25a   : > { %p583_p1 = scmp.ne.s32.totalorder %s830_s8, %s582_s25  ;;  %p587_p3 = scmp.lt.u32.totalorder %s830_s8, %s877_s3 }
 0x25b   : > { %p588_p11 = scmp.lt.u32.totalorder %s586_s26, %s582_s25  ;;  %p590_p6 = scmp.lt.u32.totalorder %s582_s25, %s830_s8 }
 0x25c   : > { %p584_p2 = pnand %p583_p1, %p758_p8 }
 0x25d   : > { %p589_p4 = por %p588_p11, %p587_p3 }
 0x25e   : > { %p585_p7 = pneg %p584_p2 }
 0x25f   : > { %p591_p9 = por %p590_p6, %p589_p4 }
 0x261   : > { %p592_p12 = pnand %p591_p9, %p585_p7 }
 0x263   : > { %595 = shalt.err (!%p592_p12)
}
 0x264   : > { %451 = dma.vmem_to_hbm [thread:$0]  (%p758_p8), %s832_s30, 128, %s830_s8, %s323_s9  }
 0x265 PF: > { %s349_s18 = sand.u32 1, %s626_s12   ;;  %p896_p13 = scmp.ne.s32.totalorder %s882_s19, 0 }
 0x266   : > { %p897_p0 = scmp.ge.s32.totalorder %s638_s15, 2  ;;  %s350_s20 = scalar_lea.sflag [#allocation4], %s349_s18 }
 0x268   : > { %p462_p5 = pnand %p897_p0, %p896_p13 }
 0x26a   : > { %621 = dma.done.wait (!%p462_p5), %s350_s20, 128  }
 0x26b   : > { %623 = vsyncadd (!%p462_p5), %s350_s20, 4294967168  ;;  %p17_p10 = scmp.ge.s32.totalorder %s714_s23, 4   ;;  %s898_s12 = smov %s630_s13 }
 0x26c   : > { %s899_s13 = smov %s634_s14  ;;  %s900_s14 = smov %s750_s11 }
 0x26d   : > { %s901_s15 = smov %s714_s23  ;;  %19 = sbr.rel (!%p17_p10) target bundleno = 6 (0x6), region = 81 }
 0x274   :  { %355 = vsyncpa [#allocation3], 1 }
 0x275   :  { %357 = vsyncpa [#allocation3 + $0x1], 1 }
 0x276   :  { %358 = vsyncpa [#allocation6], 1 }
 0x277   :  { %359 = vsyncpa [#allocation4], 1 }
 0x278   :  { %361 = vsyncpa [#allocation4 + $0x1], 1 }

</bundles_post_ra>
